<compile_context>
chip_gen: v6e
topology: v6e:2x2x1
jax: 0.10.0
libtpu: 0.0.40
codegen_flags: <defaults>
</compile_context>

<pallas_src>
import jax
import jax.numpy as jnp
from jax.experimental import pallas as pl
from jax.experimental.pallas import tpu as pltpu


def fused_mlp_kernel(x_ref, w_ref, b_ref, o_ref):
    # One fused affine map: logits = x @ W_fused + b_fused   [TILE_N, C]
    logits = jnp.dot(x_ref[...], w_ref[...],
                     preferred_element_type=jnp.float32) + b_ref[...]

    # ELU (alpha = 1.0): x if x > 0 else exp(x) - 1   (f32 on the VPU/EUP)
    elu = jnp.where(logits > 0, logits, jnp.exp(logits) - 1.0)

    # LogSoftmax along the class axis (row-wise XLU reductions + EUP exp/log).
    m = jnp.max(elu, axis=-1, keepdims=True)
    z = elu - m
    lse = jnp.log(jnp.sum(jnp.exp(z), axis=-1, keepdims=True))
    o_ref[...] = (z - lse).astype(o_ref.dtype)


def _round_up(x, m):
    return ((x + m - 1) // m) * m


def prepare_params(params, dtype=jnp.float32):
    """One-time collapse of the 3 Linears into a single affine map.

    Returns (w_fused [F, C] in `dtype`, b_fused [1, C] in f32). Use
    dtype=jnp.bfloat16 on v6e/v7x (with bf16 x) to halve matmul-input DMA.
    """
    w1, b1, w2, b2, w3, b3 = params
    w_fused = (w1 @ w2 @ w3).astype(dtype)                     # [F, C]
    b_fused = (b1 @ w2 @ w3 + b2 @ w3 + b3).astype(jnp.float32)  # [1, C]
    return w_fused, b_fused


def net_forward(x, fused_params, *, tile_n=2048):
    """Mirrors Net.forward: returns (log_probs, None, None).

    `fused_params` comes from prepare_params(); the hot path is exactly one
    pallas_call (no padding, no post-slice, no per-call weight fusion).
    """
    w_fused, b_fused = fused_params
    n, f = x.shape
    c = w_fused.shape[1]

    # Adaptive row tile: big enough to amortize per-step overhead (~0.35 us),
    # small enough that the grid has >= 2 steps when N allows it so the
    # "parallel" axis shards across v7x's two TensorCores.
    tn = max(8, min(tile_n, _round_up(max(pl.cdiv(n, 2), 1), 8)))
    grid = (pl.cdiv(n, tn),)

    bytes_in = n * f * x.dtype.itemsize + f * c * w_fused.dtype.itemsize + c * 4
    cost = pl.CostEstimate(
        flops=2 * n * f * c,
        transcendentals=2 * n * c + n,
        bytes_accessed=bytes_in + n * c * 4,
    )

    out = pl.pallas_call(
        fused_mlp_kernel,
        out_shape=jax.ShapeDtypeStruct((n, c), jnp.float32),
        grid=grid,
        in_specs=[
            # Streaming x row-tiles. If DMA ever shows exposed, add
            # pipeline_mode=pl.Buffered(3) here (W/b stay default: resident).
            pl.BlockSpec((tn, f), lambda i: (i, 0)),
            pl.BlockSpec((f, c), lambda i: (0, 0)),   # fused W, VMEM-resident
            pl.BlockSpec((1, c), lambda i: (0, 0)),   # fused b, VMEM-resident
        ],
        out_specs=pl.BlockSpec((tn, c), lambda i: (i, 0)),
        compiler_params=pltpu.CompilerParams(
            dimension_semantics=("parallel",),         # shard rows across TCs
        ),
        cost_estimate=cost,
    )(x, w_fused, b_fused)

    return out, None, None


def init_params(key, num_features, hidden1, hidden2, num_classes):
    """Deterministic param init (Linear weights stored transposed: [in, out])."""
    keys = jax.random.split(key, 6)

    def linear(kw, kb, fan_in, fan_out):
        bound = 1.0 / jnp.sqrt(fan_in)
        w = jax.random.uniform(kw, (fan_in, fan_out), jnp.float32, -bound, bound)
        b = jax.random.uniform(kb, (1, fan_out), jnp.float32, -bound, bound)
        return w, b

    w1, b1 = linear(keys[0], keys[1], num_features, hidden1)
    w2, b2 = linear(keys[2], keys[3], hidden1, hidden2)
    w3, b3 = linear(keys[4], keys[5], hidden2, num_classes)
    return w1, b1, w2, b2, w3, b3


def _reference(x, params):
    # Layer-by-layer reference (note: the fused kernel is not bitwise
    # identical to this — fp32 rounding order differs after the collapse).
    w1, b1, w2, b2, w3, b3 = params
    h = x @ w1 + b1
    h = h @ w2 + b2
    logits = h @ w3 + b3
    elu = jnp.where(logits > 0, logits, jnp.exp(logits) - 1.0)
    return jax.nn.log_softmax(elu, axis=1)


if __name__ == "__main__":
    # Small shapes consistent with the module: N nodes with F features each.
    N, F = 8, 16           # data.x : [N, num_node_features]
    H1, H2, C = 32, 32, 8  # args.hidden1, args.hidden2, dataset.num_classes

    key = jax.random.PRNGKey(0)
    kx, kp, kx2 = jax.random.split(key, 3)
    params = init_params(kp, F, H1, H2, C)
    fused = prepare_params(params)            # one-time, off the hot path

    # Toy-sized check (single grid step).
    x = jax.random.normal(kx, (N, F), jnp.float32)
    log_probs, _, _ = net_forward(x, fused)
    jax.block_until_ready(log_probs)
    assert log_probs.shape == (N, C)
    assert jnp.allclose(log_probs, _reference(x, params), atol=3e-5, rtol=1e-5)

    # Non-multiple row count + multiple grid steps: exercises the ragged edge
    # block (garbage rows are per-row only and never written back) and the
    # pipelined "parallel" grid.
    x2 = jax.random.normal(kx2, (300, F), jnp.float32)
    log_probs2, _, _ = net_forward(x2, fused)
    jax.block_until_ready(log_probs2)
    assert log_probs2.shape == (300, C)
    assert jnp.allclose(log_probs2, _reference(x2, params), atol=3e-5, rtol=1e-5)
    assert jnp.all(jnp.isfinite(log_probs2))   # guard the ragged-edge invariant

    # TODO(synk): Dropout is identity here (inference mode); training-mode
    # dropout would forbid the 3-Linear collapse and need pltpu.prng_seed +
    # pltpu.prng_random_bits masking between the matmuls.
    print("KERNEL_OK")
</pallas_src>

<mosaic_0001>
module attributes {stable_mosaic.version = 11 : i64} {
  func.func @fused_mlp_kernel(%arg0: i32, %arg1: memref<8x16xf32, #tpu.memory_space<vmem>>, %arg2: memref<16x8xf32, #tpu.memory_space<vmem>>, %arg3: memref<1x8xf32, #tpu.memory_space<vmem>>, %arg4: memref<8x8xf32, #tpu.memory_space<vmem>>) attributes {dimension_semantics = [#tpu.dimension_semantics<parallel>], iteration_bounds = array<i64: 1>, scalar_prefetch = 0 : i64, scratch_operands = 0 : i64, tpu.core_type = #tpu.core_type<tc>, window_params = [{transform_indices = @transform_0, window_bounds = array<i64: 8, 16>}, {pipeline_mode = #tpu.pipeline_mode<synchronous>, transform_indices = @transform_1, window_bounds = array<i64: 16, 8>}, {pipeline_mode = #tpu.pipeline_mode<synchronous>, transform_indices = @transform_2, window_bounds = array<i64: 1, 8>}, {transform_indices = @transform_3, window_bounds = array<i64: 8, 8>}]} {
    %c0 = arith.constant 0 : index
    %c0_0 = arith.constant 0 : index
    %0 = vector.load %arg1[%c0, %c0_0] : memref<8x16xf32, #tpu.memory_space<vmem>>, vector<8x16xf32>
    %c0_1 = arith.constant 0 : index
    %c0_2 = arith.constant 0 : index
    %1 = vector.load %arg2[%c0_1, %c0_2] : memref<16x8xf32, #tpu.memory_space<vmem>>, vector<16x8xf32>
    %cst = arith.constant dense<0.000000e+00> : vector<8x8xf32>
    %2 = tpu.matmul %0, %1, %cst {dimension_numbers = #tpu.dot_dimension_numbers<[1], [0], [0], [1], [0, 0, 1, 1], [], []>} : vector<8x16xf32>, vector<16x8xf32>, vector<8x8xf32> -> vector<8x8xf32>
    %c0_3 = arith.constant 0 : index
    %c0_4 = arith.constant 0 : index
    %3 = vector.load %arg3[%c0_3, %c0_4] : memref<1x8xf32, #tpu.memory_space<vmem>>, vector<1x8xf32>
    %4 = vector.broadcast %3 : vector<1x8xf32> to vector<8x8xf32>
    %5 = arith.addf %2, %4 : vector<8x8xf32>
    %cst_5 = arith.constant 0.000000e+00 : f32
    %6 = vector.broadcast %cst_5 : f32 to vector<8x8xf32>
    %7 = arith.cmpf ogt, %5, %6 : vector<8x8xf32>
    %8 = math.exp %5 : vector<8x8xf32>
    %cst_6 = arith.constant 1.000000e+00 : f32
    %9 = vector.broadcast %cst_6 : f32 to vector<8x8xf32>
    %10 = arith.subf %8, %9 : vector<8x8xf32>
    %11 = arith.select %7, %5, %10 : vector<8x8xi1>, vector<8x8xf32>
    %cst_7 = arith.constant dense<0xFF800000> : vector<8xf32>
    %12 = vector.multi_reduction <maximumf>, %11, %cst_7 [1] : vector<8x8xf32> to vector<8xf32>
    %13 = vector.shape_cast %12 : vector<8xf32> to vector<8x1xf32>
    %14 = vector.broadcast %13 : vector<8x1xf32> to vector<8x8xf32>
    %15 = arith.subf %11, %14 : vector<8x8xf32>
    %16 = math.exp %15 : vector<8x8xf32>
    %cst_8 = arith.constant dense<0.000000e+00> : vector<8xf32>
    %17 = vector.multi_reduction <add>, %16, %cst_8 [1] : vector<8x8xf32> to vector<8xf32>
    %18 = vector.shape_cast %17 : vector<8xf32> to vector<8x1xf32>
    %19 = math.log %18 : vector<8x1xf32>
    %20 = vector.broadcast %19 : vector<8x1xf32> to vector<8x8xf32>
    %21 = arith.subf %15, %20 : vector<8x8xf32>
    %c0_9 = arith.constant 0 : index
    %c0_10 = arith.constant 0 : index
    %22 = vector.load %arg4[%c0_9, %c0_10] : memref<8x8xf32, #tpu.memory_space<vmem>>, vector<8x8xf32>
    tpu.vector_store %arg4[%c0_9, %c0_10], %21 {strides = array<i32>} : memref<8x8xf32, #tpu.memory_space<vmem>>, vector<8x8xf32>,
    return
  }
  func.func @transform_0(%arg0: i32) -> (i32, i32) {
    %c0_i32 = arith.constant 0 : i32
    %c0_i32_0 = arith.constant 0 : i32
    return %arg0, %c0_i32 : i32, i32
  }
  func.func @transform_1(%arg0: i32) -> (i32, i32) {
    %c0_i32 = arith.constant 0 : i32
    %c0_i32_0 = arith.constant 0 : i32
    %c0_i32_1 = arith.constant 0 : i32
    return %c0_i32, %c0_i32_0 : i32, i32
  }
  func.func @transform_2(%arg0: i32) -> (i32, i32) {
    %c0_i32 = arith.constant 0 : i32
    %c0_i32_0 = arith.constant 0 : i32
    %c0_i32_1 = arith.constant 0 : i32
    return %c0_i32, %c0_i32_0 : i32, i32
  }
  func.func @transform_3(%arg0: i32) -> (i32, i32) {
    %c0_i32 = arith.constant 0 : i32
    %c0_i32_0 = arith.constant 0 : i32
    return %arg0, %c0_i32 : i32, i32
  }
}

</mosaic_0001>

<bundles_post_ra>
// kernel: tpu_custom_call.1
= control target key start
LH: loop header
LB: loop body
LE: loop exit
PB: predicated region body
PF: predicated region fallthrough
CT: control target
= control target key end

     0   :  { %v176_v1 = vmov 0.0   ;;  %vm177_vm0 = vmmov 0   ;;  %s217_s0 = inlined_call_operand.vmem [shape: f32[8,16], index: 0, kind: input, shape index: {}]   ;;  %s218_s1 = inlined_call_operand.vmem [shape: f32[16,8], index: 1, kind: input, shape index: {}]   ;;  %s219_s2 = inlined_call_operand.vmem [shape: f32[1,8], index: 2, kind: input, shape index: {}]   ;;  %s220_s3 = inlined_call_operand.hbm [shape: f32[8,8], index: 3, kind: output, shape index: {}]  }
   0x1   :  { %v17_v0 = vld [vmem:[%s218_s1 + $0x8] sm:$0xff]  ;;  %138 = vmatprep.subr.mxu0 %v176_v1  ;;  %v16_v2 = vld [vmem:[%s218_s1] sm:$0xff]  ;;  %142 = vmatprep.mubr.msk.f32.mxu0 %vm177_vm0, %v176_v1 }
   0x2   :  { %8 = vsyncpa [#allocation3], 0  ;;  %139 = vmatpush3.msra.mxu0 %v17_v0  ;;  %v15_v3 = vld [vmem:[%s217_s0] sm:$0xff]  ;;  %vm25_vm1 = vcmask 130048   ;;  %vm104_vm2 = vcmask 64512   ;;  %s178_s0 = smov [#allocation2]  }
   0x3   :  { %140 = vmatprep.subr.mxu0 %v176_v1  ;;  %v132_v4 = vld [vmem:[%s219_s2] ss:$0 sm:$0xff]  ;;  %s124_s1 = sshll.u32 %s178_s0, 4  ;;  %s125_s1 = int_to_ptr.vmem [resolvable:$true] %s124_s1 }
   0x4   :  { %141 = vmatpush3.msra.mxu0 %v16_v2  ;;  %s154_s2 = scalar_lea.vmem %s125_s1, 128  ;;  %p159_p1 = scmp.lt.s32.totalorder %s125_s1, %s125_s1 }
   0x5   :  { %143 = vmatmul.mubr.msk.f32.vlgmr.msra.gmra.mxu0 %vm25_vm1, %v15_v3  ;;  %p155_p0 = scmp.ne.s32.totalorder %s125_s1, %s154_s2  ;;  %p160_p2 = scmp.lt.s32.totalorder %s154_s2, %s154_s2 }
   0x7   :  { %p161_p3 = por %p160_p2, %p159_p1 }
   0x9   :  { %p162_p4 = pnand %p161_p3, %p155_p0 }
  0xc5   :  { %v95_v5 = vpop.f32.mrf.mxu0 }
  0xc6   :  { %v96_v6 = vadd.f32 %v132_v4, %v95_v5 }
  0xc7   :  { %v144_v7 = vpop.f32.mrf.mxu0 }
  0xc8   :  { %v100_v8 = vmul.f32 1.442695, %v96_v6  ;;  %vm99_vm3 = vcmp.gt.f32.partialorder %v96_v6, 0.0 }
  0xca   :  { %148 = vpow2.f32 %v100_v8 }
  0xd7   :  { %v149_v9 = vpop.eup %148 }
  0xd8   :  { %v134_v10 = vadd.f32 -1.0, %v149_v9 }
  0xda   :  { %v103_v11 = vsel %vm99_vm3, %v96_v6, %v134_v10 }
  0xdb   :  { %v105_v12 = vsel %vm104_vm2, %v103_v11, -inf }
  0xdc   :  { %106 = vmax.xlane.f32.xlu0 %v105_v12 }
 0x165   :  { %v107_v13 = vpop.xlane.xlu0 %106 }
 0x166   :  { %v108_v14 = vsub.f32 %v103_v11, %v107_v13 }
 0x168   :  { %v109_v15 = vmul.f32 1.442695, %v108_v14 }
 0x16a   :  { %150 = vpow2.f32 %v109_v15 }
 0x177   :  { %v151_v16 = vpop.eup %150 }
 0x178   :  { %v111_v17 = vsel %vm104_vm2, %v151_v16, 0.0 }
 0x179   :  { %112 = vadd.xlane.f32.xlu0 %v111_v17 }
 0x202   :  { %v113_v18 = vpop.xlane.xlu0 %112 }
 0x203   :  { %152 = vlog2.f32 %v113_v18 }
 0x210   :  { %v153_v19 = vpop.eup %152 }
 0x211   :  { %v115_v20 = vmul.f32 0.6931472, %v153_v19 }
 0x213   :  { %v116_v21 = vsub.f32 %v108_v14, %v115_v20 }
 0x215   :  { %117 = vst.msk [vmem:[#allocation2] sm:$0xff] %vm104_vm2, %v116_v21 }
 0x216   :  { %165 = shalt.err (!%p162_p4)
}
 0x217   :  { %127 = dma.vmem_to_hbm [thread:$0]  %s125_s1, 128, %s220_s3, [#allocation3]  }
 0x218   :  { %174 = dma.done.wait [#allocation3], 128  }
 0x219   :  { %175 = vsyncadd [#allocation3], 4294967168 }
 0x21a   :  { %131 = vsyncpa [#allocation3], 1 }

</bundles_post_ra>
